<compile_context>
chip_gen: v5e
topology: v5e:2x2
jax: 0.10.0
libtpu: 0.0.40
codegen_flags: <defaults>
</compile_context>

<pallas_src>
import jax
import jax.numpy as jnp
from jax.experimental import pallas as pl
from jax.experimental.pallas import tpu as pltpu


def _ada_final_layer_kernel(x_ref, ms_ref, w_lin_ref, b_lin_ref, o_ref):
    # One grid step == one (batch, seq-tile) block.
    x = x_ref[0].astype(jnp.float32)                       # (TS, H)

    ms = ms_ref[0].astype(jnp.float32)                     # (2, H)
    mult = ms[0:1, :]                                      # (1, H) = gamma*(1+scale)
    shift = ms[1:2, :]                                     # (1, H)

    # Fused LayerNorm (one-pass statistics) + adaLN modulate, kept in vregs.
    mean = jnp.mean(x, axis=-1, keepdims=True)             # (TS, 1)
    var = jnp.maximum(jnp.mean(x * x, axis=-1, keepdims=True) - mean * mean, 0.0)
    y = (x - mean) * (jax.lax.rsqrt(var + 1e-5) * mult) + shift

    # Final projection on the MXU: (TS, H) @ (H, C_pad), f32 accumulation.
    out = jnp.dot(y.astype(w_lin_ref.dtype), w_lin_ref[...],
                  preferred_element_type=jnp.float32)
    out = out + b_lin_ref[...].astype(jnp.float32)         # (TS, C_pad)

    # Store only the real channels; output stays unpadded in HBM.
    C = o_ref.shape[-1]
    o_ref[0] = out[:, :C].astype(o_ref.dtype)


def _pick_seq_tile(B, S, H, C, C_pad, x_itemsize, out_itemsize,
                   vmem_limit, seq_tile):
    if S <= seq_tile:
        TS = S                                   # full-dim block: always legal
    else:
        TS = max(8, (seq_tile // 8) * 8)

    def buf_bytes(ts):
        xbuf = 2 * ts * H * x_itemsize           # double-buffered x tiles
        obuf = 2 * ts * C * out_itemsize         # double-buffered out tiles
        wbuf = 2 * (H * C_pad + C_pad) * 4       # resident weight + bias
        live = 2 * ts * max(H, C_pad) * 4        # fused LN / matmul live values
        return xbuf + obuf + wbuf + live

    while TS > 8 and buf_bytes(TS) > vmem_limit - (4 << 20):
        TS = max(8, (TS // 2) // 8 * 8)

    # v7x has 2 TensorCores: make sure there are >= 2 grid blocks to shard.
    if B * pl.cdiv(S, TS) < 2 and S >= 16:
        TS = max(8, (pl.cdiv(S, 2) + 7) // 8 * 8)
    return TS


def ada_transformer_final_layer(x, c, w_ada, b_ada, gamma, w_lin, b_lin,
                                *, seq_tile=1024, out_dtype=None):
    """x: (B, S, H); c: (B, cond).  Returns (B, S, C)."""
    B, S, H = x.shape
    C = w_lin.shape[1]
    out_dtype = out_dtype or x.dtype

    # ---- adaLN modulation hoisted out of the kernel (tiny M=1 GEMM) --------
    mod = (c.astype(jnp.float32) @ w_ada.astype(jnp.float32)
           + b_ada.astype(jnp.float32))                       # (B, 2H)
    shift = mod[:, :H]
    scale = mod[:, H:]
    mult = gamma.astype(jnp.float32)[None, :] * (1.0 + scale)  # gamma*(1+scale)
    ms = jnp.stack([mult, shift], axis=1)                     # (B, 2, H)

    # ---- Pad only the matmul N dim (weights), never the output -------------
    C_pad = pl.cdiv(C, 128) * 128
    w_lin_p = jnp.zeros((H, C_pad), w_lin.dtype).at[:, :C].set(w_lin)
    b_lin_p = jnp.zeros((1, C_pad), jnp.float32).at[0, :C].set(
        b_lin.astype(jnp.float32))

    # ---- VMEM budget & sequence tile ----------------------------------------
    try:
        vmem_cap = int(pltpu.get_tpu_info().vmem_capacity_bytes)
    except Exception:  # conservative fallback (safe on v5e/v6e/v7x)
        vmem_cap = 64 * 1024 * 1024
    vmem_limit = int(min(max(vmem_cap - 24 * 1024 * 1024, 32 * 1024 * 1024),
                         100 * 1024 * 1024))

    out_itemsize = jnp.dtype(out_dtype).itemsize
    TS = _pick_seq_tile(B, S, H, C, C_pad, x.dtype.itemsize, out_itemsize,
                        vmem_limit, seq_tile)
    n_s = pl.cdiv(S, TS)        # ragged last block handled by Pallas masking

    flops = 2 * B * S * H * C_pad + 10 * B * S * H
    bytes_accessed = (B * S * H * x.dtype.itemsize
                      + B * S * C * out_itemsize
                      + H * C_pad * jnp.dtype(w_lin.dtype).itemsize
                      + 2 * B * H * 4 + C_pad * 4)

    grid_spec = pltpu.PrefetchScalarGridSpec(
        num_scalar_prefetch=0,
        grid=(B, n_s),
        in_specs=[
            pl.BlockSpec((1, TS, H), lambda b, s: (b, s, 0)),   # x tile
            pl.BlockSpec((1, 2, H), lambda b, s: (b, 0, 0)),    # mult/shift
            pl.BlockSpec((H, C_pad), lambda b, s: (0, 0)),      # W_lin (resident)
            pl.BlockSpec((1, C_pad), lambda b, s: (0, 0)),      # b_lin
        ],
        out_specs=pl.BlockSpec((1, TS, C), lambda b, s: (b, s, 0)),
    )

    return pl.pallas_call(
        _ada_final_layer_kernel,
        out_shape=jax.ShapeDtypeStruct((B, S, C), out_dtype),
        grid_spec=grid_spec,
        compiler_params=pltpu.CompilerParams(
            dimension_semantics=("parallel", "parallel"),
            vmem_limit_bytes=vmem_limit),
        cost_estimate=pl.CostEstimate(
            flops=int(flops),
            transcendentals=int(B * S),
            bytes_accessed=int(bytes_accessed)),
    )(x, ms, w_lin_p, b_lin_p)


def _reference(x, c, w_ada, b_ada, gamma, w_lin, b_lin):
    H = gamma.shape[0]
    mod = c @ w_ada + b_ada                                   # (B, 2H)
    shift = mod[:, None, :H]                                  # (B, 1, H)
    scale = mod[:, None, H:]                                  # (B, 1, H)
    mean = jnp.mean(x, axis=-1, keepdims=True)
    var = jnp.mean((x - mean) ** 2, axis=-1, keepdims=True)
    xn = (x - mean) / jnp.sqrt(var + 1e-5) * gamma
    y = xn * (1.0 + scale) + shift
    return y @ w_lin + b_lin


if __name__ == "__main__":
    B, S, H, COND, C = 2, 8, 32, 16, 8

    key = jax.random.PRNGKey(0)
    kx, kc, k1, k2, k3, k4 = jax.random.split(key, 6)

    x = jax.random.normal(kx, (B, S, H), dtype=jnp.float32)
    c = jax.random.normal(kc, (B, COND), dtype=jnp.float32)

    # Parameter shapes from __init__ (stored transposed for right-multiply):
    #   adaLN_modulation: Linear(cond_dim, 2*hidden)  -> W (cond, 2H), b (2H,)
    #   linear:           Linear(hidden, out_channels)-> W (H, C),     b (C,)
    #   norm_final:       LayerNorm(hidden) weight    -> gamma (H,)
    # Small non-zero values instead of the module's zero-init so the kernel
    # computes something non-trivial.
    w_ada = 0.02 * jax.random.normal(k1, (COND, 2 * H), dtype=jnp.float32)
    b_ada = 0.01 * jax.random.normal(k2, (2 * H,), dtype=jnp.float32)
    gamma = jnp.ones((H,), dtype=jnp.float32)
    w_lin = 0.02 * jax.random.normal(k3, (H, C), dtype=jnp.float32)
    b_lin = 0.01 * jax.random.normal(k4, (C,), dtype=jnp.float32)

    # Run the whole wrapper (adaLN GEMM + weight pad + pallas_call) under one
    # jit so XLA fuses the tiny preprocessing with its neighbours.
    fn = jax.jit(ada_transformer_final_layer)
    out = jax.block_until_ready(fn(x, c, w_ada, b_ada, gamma, w_lin, b_lin))

    ref = _reference(x, c, w_ada, b_ada, gamma, w_lin, b_lin)
    assert out.shape == (B, S, C)
    assert jnp.allclose(out, ref, atol=1e-5, rtol=1e-5), "mismatch vs reference"

    print("KERNEL_OK")
</pallas_src>

<mosaic_0001>
module attributes {stable_mosaic.version = 11 : i64} {
  func.func @_ada_final_layer_kernel(%arg0: i32, %arg1: i32, %arg2: memref<1x8x32xf32, #tpu.memory_space<vmem>>, %arg3: memref<1x2x32xf32, #tpu.memory_space<vmem>>, %arg4: memref<32x128xf32, #tpu.memory_space<vmem>>, %arg5: memref<1x128xf32, #tpu.memory_space<vmem>>, %arg6: memref<1x8x8xf32, #tpu.memory_space<vmem>>) attributes {dimension_semantics = [#tpu.dimension_semantics<parallel>, #tpu.dimension_semantics<parallel>], iteration_bounds = array<i64: 2, 1>, scalar_prefetch = 0 : i64, scratch_operands = 0 : i64, tpu.core_type = #tpu.core_type<tc>, window_params = [{transform_indices = @transform_0, window_bounds = array<i64: 1, 8, 32>}, {transform_indices = @transform_1, window_bounds = array<i64: 1, 2, 32>}, {pipeline_mode = #tpu.pipeline_mode<synchronous>, transform_indices = @transform_2, window_bounds = array<i64: 32, 128>}, {pipeline_mode = #tpu.pipeline_mode<synchronous>, transform_indices = @transform_3, window_bounds = array<i64: 1, 128>}, {transform_indices = @transform_4, window_bounds = array<i64: 1, 8, 8>}]} {
    %c0 = arith.constant 0 : index
    %c0_0 = arith.constant 0 : index
    %c0_1 = arith.constant 0 : index
    %0 = vector.load %arg2[%c0, %c0_0, %c0_1] : memref<1x8x32xf32, #tpu.memory_space<vmem>>, vector<1x8x32xf32>
    %1 = vector.shape_cast %0 : vector<1x8x32xf32> to vector<8x32xf32>
    %c0_2 = arith.constant 0 : index
    %c0_3 = arith.constant 0 : index
    %c0_4 = arith.constant 0 : index
    %2 = vector.load %arg3[%c0_2, %c0_3, %c0_4] : memref<1x2x32xf32, #tpu.memory_space<vmem>>, vector<1x2x32xf32>
    %3 = vector.shape_cast %2 : vector<1x2x32xf32> to vector<2x32xf32>
    %4 = vector.extract_strided_slice %3 {offsets = [0, 0], sizes = [1, 32], strides = [1, 1]} : vector<2x32xf32> to vector<1x32xf32>
    %5 = vector.extract_strided_slice %3 {offsets = [1, 0], sizes = [1, 32], strides = [1, 1]} : vector<2x32xf32> to vector<1x32xf32>
    %cst = arith.constant dense<0.000000e+00> : vector<8xf32>
    %6 = vector.multi_reduction <add>, %1, %cst [1] : vector<8x32xf32> to vector<8xf32>
    %7 = vector.shape_cast %6 : vector<8xf32> to vector<8x1xf32>
    %cst_5 = arith.constant 3.200000e+01 : f32
    %8 = vector.broadcast %cst_5 : f32 to vector<8x1xf32>
    %9 = arith.divf %7, %8 : vector<8x1xf32>
    %10 = arith.mulf %1, %1 : vector<8x32xf32>
    %cst_6 = arith.constant dense<0.000000e+00> : vector<8xf32>
    %11 = vector.multi_reduction <add>, %10, %cst_6 [1] : vector<8x32xf32> to vector<8xf32>
    %12 = vector.shape_cast %11 : vector<8xf32> to vector<8x1xf32>
    %cst_7 = arith.constant 3.200000e+01 : f32
    %13 = vector.broadcast %cst_7 : f32 to vector<8x1xf32>
    %14 = arith.divf %12, %13 : vector<8x1xf32>
    %15 = arith.mulf %9, %9 : vector<8x1xf32>
    %16 = arith.subf %14, %15 : vector<8x1xf32>
    %cst_8 = arith.constant 0.000000e+00 : f32
    %17 = vector.broadcast %cst_8 : f32 to vector<8x1xf32>
    %18 = arith.maximumf %16, %17 : vector<8x1xf32>
    %19 = vector.broadcast %9 : vector<8x1xf32> to vector<8x32xf32>
    %20 = arith.subf %1, %19 : vector<8x32xf32>
    %cst_9 = arith.constant 9.99999974E-6 : f32
    %21 = vector.broadcast %cst_9 : f32 to vector<8x1xf32>
    %22 = arith.addf %18, %21 : vector<8x1xf32>
    %23 = math.rsqrt %22 : vector<8x1xf32>
    %24 = vector.broadcast %23 : vector<8x1xf32> to vector<8x32xf32>
    %25 = vector.broadcast %4 : vector<1x32xf32> to vector<8x32xf32>
    %26 = arith.mulf %24, %25 : vector<8x32xf32>
    %27 = arith.mulf %20, %26 : vector<8x32xf32>
    %28 = vector.broadcast %5 : vector<1x32xf32> to vector<8x32xf32>
    %29 = arith.addf %27, %28 : vector<8x32xf32>
    %c0_10 = arith.constant 0 : index
    %c0_11 = arith.constant 0 : index
    %30 = vector.load %arg4[%c0_10, %c0_11] : memref<32x128xf32, #tpu.memory_space<vmem>>, vector<32x128xf32>
    %cst_12 = arith.constant dense<0.000000e+00> : vector<8x128xf32>
    %31 = tpu.matmul %29, %30, %cst_12 {dimension_numbers = #tpu.dot_dimension_numbers<[1], [0], [0], [1], [0, 0, 1, 1], [], []>} : vector<8x32xf32>, vector<32x128xf32>, vector<8x128xf32> -> vector<8x128xf32>
    %c0_13 = arith.constant 0 : index
    %c0_14 = arith.constant 0 : index
    %32 = vector.load %arg5[%c0_13, %c0_14] : memref<1x128xf32, #tpu.memory_space<vmem>>, vector<1x128xf32>
    %33 = vector.broadcast %32 : vector<1x128xf32> to vector<8x128xf32>
    %34 = arith.addf %31, %33 : vector<8x128xf32>
    %35 = vector.extract_strided_slice %34 {offsets = [0, 0], sizes = [8, 8], strides = [1, 1]} : vector<8x128xf32> to vector<8x8xf32>
    %c0_15 = arith.constant 0 : index
    %c0_16 = arith.constant 0 : index
    %c0_17 = arith.constant 0 : index
    %36 = vector.load %arg6[%c0_15, %c0_16, %c0_17] : memref<1x8x8xf32, #tpu.memory_space<vmem>>, vector<1x8x8xf32>
    %37 = vector.shape_cast %36 : vector<1x8x8xf32> to vector<8x8xf32>
    %38 = vector.shape_cast %35 : vector<8x8xf32> to vector<1x8x8xf32>
    tpu.vector_store %arg6[%c0_15, %c0_16, %c0_17], %38 {strides = array<i32>} : memref<1x8x8xf32, #tpu.memory_space<vmem>>, vector<1x8x8xf32>,
    return
  }
  func.func @transform_0(%arg0: i32, %arg1: i32) -> (i32, i32, i32) {
    %c0_i32 = arith.constant 0 : i32
    %c0_i32_0 = arith.constant 0 : i32
    return %arg0, %arg1, %c0_i32 : i32, i32, i32
  }
  func.func @transform_1(%arg0: i32, %arg1: i32) -> (i32, i32, i32) {
    %c0_i32 = arith.constant 0 : i32
    %c0_i32_0 = arith.constant 0 : i32
    %c0_i32_1 = arith.constant 0 : i32
    return %arg0, %c0_i32, %c0_i32_0 : i32, i32, i32
  }
  func.func @transform_2(%arg0: i32, %arg1: i32) -> (i32, i32) {
    %c0_i32 = arith.constant 0 : i32
    %c0_i32_0 = arith.constant 0 : i32
    %c0_i32_1 = arith.constant 0 : i32
    return %c0_i32, %c0_i32_0 : i32, i32
  }
  func.func @transform_3(%arg0: i32, %arg1: i32) -> (i32, i32) {
    %c0_i32 = arith.constant 0 : i32
    %c0_i32_0 = arith.constant 0 : i32
    %c0_i32_1 = arith.constant 0 : i32
    return %c0_i32, %c0_i32_0 : i32, i32
  }
  func.func @transform_4(%arg0: i32, %arg1: i32) -> (i32, i32, i32) {
    %c0_i32 = arith.constant 0 : i32
    %c0_i32_0 = arith.constant 0 : i32
    return %arg0, %arg1, %c0_i32 : i32, i32, i32
  }
}

</mosaic_0001>

<bundles_post_ra>
// kernel: ada_transformer_final_layer.1
= control target key start
LH: loop header
LB: loop body
LE: loop exit
PB: predicated region body
PF: predicated region fallthrough
CT: control target
= control target key end

     0   :  { %9 = vsyncpa [#allocation3], 0  ;;  %s709_s0 = inlined_call_operand.vmem [shape: f32[2,8,32], index: 0, kind: input, shape index: {}]   ;;  %s710_s1 = inlined_call_operand.vmem [shape: f32[2,2,32], index: 1, kind: input, shape index: {}]   ;;  %s711_s2 = inlined_call_operand.vmem [shape: f32[32,128], index: 2, kind: input, shape index: {}]   ;;  %s712_s3 = inlined_call_operand.vmem [shape: f32[1,128], index: 3, kind: input, shape index: {}]   ;;  %s713_s4 = inlined_call_operand.hbm [shape: f32[2,8,8], index: 4, kind: output, shape index: {}]  }
   0x1   :  { %11 = vsyncpa [#allocation3 + $0x1], 0  ;;  %s587_s15 = smov 0   ;;  %s589_s16 = smov 0  }
   0x2   :  { %s591_s17 = smov 0   ;;  %s593_s18 = smov 0  }
   0x3   :  { %s595_s19 = smov 0   ;;  %s597_s20 = smov 0  }
   0x4 LB: > { %s407_s21 = sadd.s32 4294967295, %s559_s20   ;;  %s408_s22 = sadd.s32 4294967294, %s559_s20   ;;  %s559_s20 = sphi %s597_s20, %s17_s20   ;;  %s555_s19 = sphi %s595_s19, %s720_s19   ;;  %s551_s18 = sphi %s593_s18, %s719_s18   ;;  %s547_s17 = sphi %s591_s17, %s718_s17   ;;  %s543_s16 = sphi %s589_s16, %s717_s16   ;;  %s539_s15 = sphi %s587_s15, %s716_s15  }
   0x5   : > { %s29_s23 = sadd.s32 1, %s555_s19  ;;  %s134_s24 = sadd.s32 1, %s547_s17 }
   0x6   : > { %p31_p0 = scmp.ge.s32.totalorder %s29_s23, 2  ;;  %p144_p1 = scmp.ne.s32.totalorder %s547_s17, %s543_s16 }
   0x7   : > { %p145_p2 = scmp.eq.s32.totalorder %s407_s21, 1  ;;  %p150_p3 = scmp.ne.s32.totalorder %s543_s16, %s539_s15 }
   0x8   : > { %s722_s23 = smov (%p31_p0, %s29_s23), 0  ;;  %p151_p5 = scmp.eq.s32.totalorder %s408_s22, 1 }
   0x9   : > { %p627_p4 = por %p145_p2, %p144_p1  ;;  %s129_s26 = ssub.s32 %s555_s19, %s722_s23 }
   0xa   : > { %p411_p6 = scmp.ge.s32.totalorder %s559_s20, 1  ;;  %p132_p7 = scmp.eq.s32.totalorder %s129_s26, 0 }
   0xb   : > { %p634_p8 = por %p151_p5, %p150_p3  ;;  %p192_p9 = scmp.lt.s32.totalorder %s559_s20, 3 }
   0xc   : > { %s640_s28 = scalar_select %p132_p7, %s547_s17, %s134_s24  }
   0xd   : > { %p193_p10 = pnand %p411_p6, %p192_p9 }
   0xe   : > { %p224_p11 = scmp.lt.s32.totalorder (!%p193_p10), %s551_s18, 1  ;;  %s417_s6 = sshll.u32 (!%p193_p10), %s551_s18, 3 }
   0xf   : > { %196 = sbr.rel (%p193_p10) target bundleno = 313 (0x139), region = 36  ;;  %s319_s9 = scalar_lea.hbm (!%p193_p10), %s713_s4, %s417_s6 }
  0x10   : > { %s323_s14 = sshll.u32 (!%p193_p10), %s319_s9, 4  ;;  %s324_s14 = int_to_ptr.hbm [resolvable:$true] %s323_s14 }
  0x14   : > { %s644_s29 = scalar_select %p224_p11, %s551_s18, 1  ;;  %vm237_vm0 = vcmask 261120   ;;  %v561_v4 = vmov 32.0   ;;  %v277_v11 = vld [vmem:[%s711_s2 + $0x18] sm:$0xff]  ;;  %v276_v12 = vld [vmem:[%s711_s2 + $0x10] sm:$0xff]  ;;  %v275_v14 = vld [vmem:[%s711_s2 + $0x8] sm:$0xff] }
  0x15   : > { %477 = vrcp.f32 %v561_v4  ;;  %297 = vmatpush.msra.mxu0 %v277_v11  ;;  %v274_v15 = vld [vmem:[%s711_s2] sm:$0xff]  ;;  %vm305_vm5 = vcmask 64512   ;;  %s495_s18 = sshra.s32 %s324_s14, 4  ;;  %s496_s18 = int_to_ptr.hbm [resolvable:$true] %s495_s18 }
  0x16   : > { %s413_s30 = sshll.u32 %s644_s29, 3  ;;  %s414_s22 = sshll.u32 %s644_s29, 1  ;;  %v476_v37 = vld [vmem:[%s712_s3] ss:$0 sm:$0xff] }
  0x17   : > { %s230_s7 = scalar_lea.vmem %s709_s0, %s413_s30  ;;  %298 = vmatpush.msra.mxu0 %v276_v12  ;;  %s234_s30 = scalar_lea.vmem %s710_s1, %s414_s22 }
  0x18   : > { %v235_v0 = vld [vmem:[%s230_s7] sm:$0xff]  ;;  %s221_s29 = sand.u32 1, %s543_s16   ;;  %s497_s22 = scalar_lea.hbm %s496_s18, 8 }
  0x19   : > { %v238_v1 = vsel %vm237_vm0, %v235_v0, 0.0  ;;  %v249_v2 = vmul.f32 %v235_v0, %v235_v0  ;;  %299 = vmatpush.msra.mxu0 %v275_v14  ;;  %v236_v27 = vld [vmem:[%s234_s30] sm:$0x3]  ;;  %s412_s5 = sshll.u32 %s221_s29, 3  ;;  %s308_s21 = scalar_lea.sflag [#allocation3], %s221_s29 }
  0x1a   : > { %239 = vadd.xlane.f32.xlu0 %v238_v1  ;;  %v269_v29 = vperm.slane %v236_v27, 0  ;;  %v272_v34 = vperm.slane %v236_v27, 1  ;;  %s223_s12 = scalar_lea.vmem [#allocation2], %s412_s5  ;;  %p498_p12 = scmp.ne.s32.totalorder %s496_s18, %s497_s22 }
  0x1b   : > { %v250_v3 = vsel %vm237_vm0, %v249_v2, 0.0  ;;  %v478_v5 = vpop.eup %477  ;;  %300 = vmatpush.msra.mxu0 %v274_v15  ;;  %s321_s13 = sshll.u32 %s223_s12, 4  ;;  %s501_s30 = scalar_lea.hbm %s713_s4, 16  ;;  %s322_s13 = int_to_ptr.vmem [resolvable:$true] %s321_s13 }
  0x1c   : > { %v242_v6 = vmul.f32 32.0, %v478_v5  ;;  %vm246_vm1 = vweird.f32 %v478_v5  ;;  %p499_p13 = pnand %p498_p12, %p627_p4  ;;  %p502_p1 = scmp.lt.s32.totalorder %s496_s18, %s713_s4 }
  0x1d   : > { %p503_p2 = scmp.lt.s32.totalorder %s501_s30, %s497_s22 }
  0x1e   : > { %v243_v7 = vsub.f32 1.0, %v242_v6  ;;  %p500_p0 = pneg %p499_p13 }
  0x1f   : > { %p504_p3 = por %p503_p2, %p502_p1 }
  0x20   : > { %v244_v8 = vmul.f32 %v478_v5, %v243_v7 }
  0x21   : > { %p505_p5 = pnand %p504_p3, %p500_p0 }
  0x22   : > { %251 = vadd.xlane.f32.xlu0 %v250_v3  ;;  %v245_v9 = vadd.f32 %v478_v5, %v244_v8 }
  0x24   : > { %v247_v13 = vsel %vm246_vm1, %v478_v5, %v245_v9 }
  0x8d   : > { %v240_v10 = vpop.xlane.xlu0 %239 }
  0x8e   : > { %v248_v16 = vmul.f32 %v247_v13, %v240_v10 }
  0x90   : > { %v254_v18 = vmul.f32 %v248_v16, %v248_v16  ;;  %v257_v32 = vsub.f32 %v235_v0, %v248_v16 }
  0x95   : > { %v252_v17 = vpop.xlane.xlu0 %251 }
  0x96   : > { %v253_v19 = vmul.f32 %v252_v17, %v247_v13 }
  0x98   : > { %v255_v20 = vsub.f32 %v253_v19, %v254_v18 }
  0x9a   : > { %v256_v21 = vmax.f32 %v255_v20, 0.0 }
  0x9c   : > { %v258_v22 = vadd.f32 1e-05, %v256_v21 }
  0x9e   : > { %479 = vrsqrt.f32 %v258_v22  ;;  %vm265_vm3 = vweird.f32 %v258_v22 }
  0xa4   : > { %v480_v23 = vpop.eup %479 }
  0xa5   : > { %v260_v24 = vmul.f32 %v480_v23, %v258_v22  ;;  %vm266_vm2 = vweird.f32 %v480_v23 }
  0xa6   : > { %vm267_vm4 = vmor %vm265_vm3, %vm266_vm2 }
  0xa7   : > { %v261_v25 = vmul.f32 %v480_v23, %v260_v24 }
  0xa9   : > { %v262_v26 = vmul.f32 0.5, %v261_v25 }
  0xab   : > { %v263_v28 = vsub.f32 1.5, %v262_v26 }
  0xad   : > { %v264_v30 = vmul.f32 %v480_v23, %v263_v28 }
  0xaf   : > { %v268_v31 = vsel %vm267_vm4, %v480_v23, %v264_v30 }
  0xb0   : > { %v270_v33 = vmul.f32 %v269_v29, %v268_v31 }
  0xb2   : > { %v271_v35 = vmul.f32 %v270_v33, %v257_v32 }
  0xb4   : > { %v273_v36 = vadd.f32 %v272_v34, %v271_v35 }
  0xb6   : > { %415 = vmatmul.msk.f32.vlgmr.msra.gmra.mxu0 %vm237_vm0, %v273_v36 }
 0x133   : > { %v302_v38 = vpop.f32.mrf.mxu0 }
 0x134   : > { %v303_v39 = vadd.f32 %v476_v37, %v302_v38 }
 0x136   : > { %306 = vst.msk [vmem:[%s223_s12] sm:$0xff] %vm305_vm5, %v303_v39 }
 0x137   : > { %508 = shalt.err (!%p505_p5)
}
 0x138   : > { %420 = dma.vmem_to_hbm [thread:$0]  (%p627_p4), %s322_s13, 128, %s324_s14, %s308_s21  }
 0x139 PF: > { %p426_p6 = scmp.ge.s32.totalorder %s559_s20, 2  ;;  %s335_s29 = sand.u32 1, %s539_s15  }
 0x13a   : > { %s336_s7 = scalar_lea.sflag [#allocation3], %s335_s29 }
 0x13b   : > { %p423_p7 = pnand %p426_p6, %p634_p8 }
 0x13d   : > { %p424_p9 = pneg %p423_p7 }
 0x13f   : > { %534 = dma.done.wait (%p424_p9), %s336_s7, 128  }
 0x140   : > { %536 = vsyncadd (%p424_p9), %s336_s7, 4294967168  ;;  %s17_s20 = sadd.s32 1, %s559_s20   ;;  %s716_s15 = smov %s543_s16 }
 0x141   : > { %p14_p10 = scmp.ge.s32.totalorder %s17_s20, 4   ;;  %s717_s16 = smov %s547_s17 }
 0x142   : > { %s718_s17 = smov %s640_s28  ;;  %s719_s18 = smov %s555_s19 }
 0x143   : > { %s720_s19 = smov %s722_s23  ;;  %16 = sbr.rel (!%p14_p10) target bundleno = 4 (0x4), region = 74 }
 0x148   :  { %342 = vsyncpa [#allocation3], 1 }
 0x149   :  { %344 = vsyncpa [#allocation3 + $0x1], 1 }

</bundles_post_ra>
